<compile_context>
chip_gen: v6e
topology: v6e:2x2x1
jax: 0.10.0
libtpu: 0.0.40
codegen_flags: <defaults>
</compile_context>

<pallas_src>
import functools

import jax
import jax.numpy as jnp
from jax.experimental import pallas as pl
from jax.experimental.pallas import tpu as pltpu


def _pool_conv_kernel(x_ref, w2_ref, g_ref, b_ref, o_ref, acc_ref):
    # x_ref:  (R, hw_tile)  rows = (batch, channel) flattened, HW on lanes
    # w2_ref: (R, Cout)     = tile(W^T, (tb, 1)) * (1/HW), f32 (folded in wrapper)
    # g_ref:  (tb, R)       0/1 segment-sum matrix: g[i, b*Cin + k] = (b == i)
    # b_ref:  (1, Cout)     bias, f32
    # o_ref:  (tb, Cout)    output block
    # acc_ref:(R, 1)        f32 partial sums over the HW reduction axis
    k = pl.program_id(1)

    @pl.when(k == 0)
    def _():
        acc_ref[...] = jnp.zeros_like(acc_ref)

    # Streaming reduce over the HW tile (sublane-dense vld/vadd; one tiny
    # cross-lane reduce + 1-lane store per step, negligible vs the DMA).
    x = x_ref[...].astype(jnp.float32)                      # (R, hw_tile)
    acc_ref[...] += jnp.sum(x, axis=-1, keepdims=True)      # (R, 1)

    @pl.when(k == pl.num_programs(1) - 1)
    def _():
        # Finalize once per batch tile, off the DMA critical path:
        #   out[i, c] = sum_r g[i, r] * acc[r] * (W[r % Cin, c] / HW) + bias[c]
        pw = acc_ref[...] * w2_ref[...]                     # (R, Cout)
        out = jnp.dot(g_ref[...], pw,
                      preferred_element_type=jnp.float32)   # (tb, Cout)
        o_ref[...] = (out + b_ref[...]).astype(o_ref.dtype)


def _pick_batch_tile(b, cap=256):
    """Batch tile: largest multiple of 8 dividing b with b//tb >= 2 (keeps the
    parallel grid axis >= 2 for v7x's two TensorCores and keeps both the x and
    out blocks sublane-dense).  Falls back to the full batch, which is always a
    legal block extent."""
    best = None
    t = 8
    while t <= min(b // 2, cap):
        if b % t == 0:
            best = t
        t += 8
    return best if best is not None else b


def _pick_hw_tile(hw, cap_elems):
    """Largest multiple of 128 dividing hw with <= cap_elems; else full hw
    (the full extent is always a legal block dim)."""
    if hw % 128 != 0 or hw <= cap_elems:
        return hw
    best = 128
    t = 128
    while t <= cap_elems:
        if hw % t == 0:
            best = t
        t += 128
    return best


def _per_generation_tuning():
    """Return (target_x_block_bytes, vmem_limit_bytes) based on physical VMEM.

    v5e/v6e (128 MiB VMEM): ~8 MiB x-blocks, 64 MiB scoped limit.
    v7x (64 MiB VMEM) / unknown: ~6 MiB x-blocks, 32 MiB scoped limit
    (double-buffered x + tiny residents stays well under the 64 MiB ceiling).
    """
    vmem = None
    try:
        vmem = int(getattr(pltpu.get_tpu_info(), "vmem_capacity_bytes", 0)) or None
    except Exception:
        vmem = None
    if vmem is not None and vmem >= 100 * 1024 * 1024:
        return 8 * 1024 * 1024, 64 * 1024 * 1024
    return 6 * 1024 * 1024, 32 * 1024 * 1024


def pool_softmax_output(x_nchw, conv_weight, conv_bias, target_block_bytes=None):
    """Forward pass of PoolSoftmaxOutput.

    x_nchw:      (B, Cin, H, W)      float32
    conv_weight: (Cout, Cin, 1, 1)   float32 (PyTorch Conv2d layout)
    conv_bias:   (Cout,)             float32
    returns:     (B, Cout)
    """
    B, Cin, H, W = x_nchw.shape
    Cout = conv_weight.shape[0]
    HW = H * W

    tb = _pick_batch_tile(B)
    R = tb * Cin

    # Free, contiguous reshape only: rows = (batch, channel), HW on the lane axis.
    x2 = x_nchw.reshape(B * Cin, HW)

    gen_block_bytes, vmem_limit = _per_generation_tuning()
    if target_block_bytes is None:
        target_block_bytes = gen_block_bytes
    itemsize = jnp.dtype(x2.dtype).itemsize
    hw_cap = max(128, target_block_bytes // (itemsize * R))
    hw_tile = _pick_hw_tile(HW, hw_cap)

    # Fold 1/HW scale + f32 casts + weight tiling into the wrapper (once).
    inv_hw = 1.0 / float(HW)
    w = conv_weight.reshape(Cout, Cin).T.astype(jnp.float32)          # (Cin, Cout)
    w2 = jnp.tile(w, (tb, 1)) * inv_hw                                # (R, Cout)
    b = conv_bias.reshape(1, Cout).astype(jnp.float32)                # (1, Cout)
    g = (jnp.arange(R)[None, :] // Cin
         == jnp.arange(tb)[:, None]).astype(jnp.float32)              # (tb, R)

    grid = (B // tb, HW // hw_tile)

    cost = pl.CostEstimate(
        flops=2 * B * Cin * HW + 2 * B * Cin * Cout,
        transcendentals=0,
        bytes_accessed=(x2.size * itemsize
                        + w2.size * 4 + g.size * 4 + b.size * 4
                        + B * Cout * itemsize),
    )

    return pl.pallas_call(
        _pool_conv_kernel,
        out_shape=jax.ShapeDtypeStruct((B, Cout), x_nchw.dtype),
        grid_spec=pltpu.PrefetchScalarGridSpec(
            num_scalar_prefetch=0,
            grid=grid,
            in_specs=[
                pl.BlockSpec((R, hw_tile), lambda i, k: (i, k)),
                pl.BlockSpec((R, Cout), lambda i, k: (0, 0)),
                pl.BlockSpec((tb, R), lambda i, k: (0, 0)),
                pl.BlockSpec((1, Cout), lambda i, k: (0, 0)),
            ],
            out_specs=pl.BlockSpec((tb, Cout), lambda i, k: (i, 0)),
            scratch_shapes=[pltpu.VMEM((R, 1), jnp.float32)],
        ),
        compiler_params=pltpu.CompilerParams(
            dimension_semantics=("parallel", "arbitrary"),
            vmem_limit_bytes=vmem_limit,
        ),
        cost_estimate=cost,
    )(x2, w2, g, b)


def init_params(key, in_channels, out_classes):
    """Deterministic Conv2d(in_channels, out_classes, kernel_size=1) init
    (uniform(-k, k), k = 1/sqrt(fan_in), matching PyTorch defaults)."""
    k = 1.0 / jnp.sqrt(jnp.float32(in_channels))  # fan_in = in_channels * 1 * 1
    kw, kb = jax.random.split(key)
    weight = jax.random.uniform(kw, (out_classes, in_channels, 1, 1),
                                jnp.float32, minval=-k, maxval=k)
    bias = jax.random.uniform(kb, (out_classes,), jnp.float32,
                              minval=-k, maxval=k)
    return weight, bias


def _reference(x_nchw, conv_weight, conv_bias):
    # Pure-JAX reference of the PyTorch forward (no softmax is applied).
    Cout, Cin = conv_weight.shape[0], conv_weight.shape[1]
    w = conv_weight.reshape(Cout, Cin)
    conv = jnp.einsum("bkhw,ck->bchw", x_nchw, w) + conv_bias[None, :, None, None]
    return jnp.mean(conv, axis=(2, 3))                      # (B, Cout)


if __name__ == "__main__":
    key = jax.random.PRNGKey(0)
    k_x, k_x2, k_p = jax.random.split(key, 3)

    B, Cin, H, W = 2, 4, 16, 16
    Cout = 10

    x = jax.random.normal(k_x, (B, Cin, H, W), jnp.float32)
    weight, bias = init_params(k_p, Cin, Cout)

    # 1) Default tiling (single grid step on both axes at these tiny shapes).
    out = jax.block_until_ready(pool_softmax_output(x, weight, bias))
    ref = _reference(x, weight, bias)
    assert out.shape == (B, Cout), out.shape
    assert jnp.allclose(out, ref, atol=1e-5, rtol=1e-5), (out, ref)

    # 2) Force multiple HW reduction steps (exercises the pl.when accumulate path).
    out_k = jax.block_until_ready(
        pool_softmax_output(x, weight, bias, target_block_bytes=4096))
    assert jnp.allclose(out_k, ref, atol=1e-5, rtol=1e-5), (out_k, ref)

    # 3) Larger batch (exercises tb < B and >1 step on the parallel batch axis).
    B2 = 16
    x_big = jax.random.normal(k_x2, (B2, Cin, H, W), jnp.float32)
    out_b = jax.block_until_ready(pool_softmax_output(x_big, weight, bias))
    ref_b = _reference(x_big, weight, bias)
    assert out_b.shape == (B2, Cout), out_b.shape
    assert jnp.allclose(out_b, ref_b, atol=1e-5, rtol=1e-5), (out_b, ref_b)

    print("KERNEL_OK")
</pallas_src>

<mosaic_0001>
module attributes {stable_mosaic.version = 11 : i64} {
  func.func @_pool_conv_kernel(%arg0: i32, %arg1: i32, %arg2: memref<8x256xf32, #tpu.memory_space<vmem>>, %arg3: memref<8x10xf32, #tpu.memory_space<vmem>>, %arg4: memref<2x8xf32, #tpu.memory_space<vmem>>, %arg5: memref<1x10xf32, #tpu.memory_space<vmem>>, %arg6: memref<2x10xf32, #tpu.memory_space<vmem>>, %arg7: memref<8x1xf32, #tpu.memory_space<vmem>>) attributes {dimension_semantics = [#tpu.dimension_semantics<parallel>, #tpu.dimension_semantics<arbitrary>], iteration_bounds = array<i64: 1, 1>, scalar_prefetch = 0 : i64, scratch_operands = 1 : i64, tpu.core_type = #tpu.core_type<tc>, window_params = [{transform_indices = @transform_0, window_bounds = array<i64: 8, 256>}, {pipeline_mode = #tpu.pipeline_mode<synchronous>, transform_indices = @transform_1, window_bounds = array<i64: 8, 10>}, {pipeline_mode = #tpu.pipeline_mode<synchronous>, transform_indices = @transform_2, window_bounds = array<i64: 2, 8>}, {pipeline_mode = #tpu.pipeline_mode<synchronous>, transform_indices = @transform_3, window_bounds = array<i64: 1, 10>}, {transform_indices = @transform_4, window_bounds = array<i64: 2, 10>}]} {
    %c0_i32 = arith.constant 0 : i32
    %0 = arith.cmpi eq, %arg1, %c0_i32 : i32
    %1 = arith.extui %0 : i1 to i32
    %c0_i32_0 = arith.constant 0 : i32
    %2 = arith.cmpi ne, %1, %c0_i32_0 : i32
    scf.if %2 {
      %cst_8 = arith.constant 0.000000e+00 : f32
      %12 = vector.broadcast %cst_8 : f32 to vector<8x1xf32>
      %c0_9 = arith.constant 0 : index
      %c0_10 = arith.constant 0 : index
      %13 = vector.load %arg7[%c0_9, %c0_10] : memref<8x1xf32, #tpu.memory_space<vmem>>, vector<8x1xf32>
      tpu.vector_store %arg7[%c0_9, %c0_10], %12 {strides = array<i32>} : memref<8x1xf32, #tpu.memory_space<vmem>>, vector<8x1xf32>,
    } else {
    }
    %c0 = arith.constant 0 : index
    %c0_1 = arith.constant 0 : index
    %3 = vector.load %arg2[%c0, %c0_1] : memref<8x256xf32, #tpu.memory_space<vmem>>, vector<8x256xf32>
    %c0_2 = arith.constant 0 : index
    %c0_3 = arith.constant 0 : index
    %4 = vector.load %arg7[%c0_2, %c0_3] : memref<8x1xf32, #tpu.memory_space<vmem>>, vector<8x1xf32>
    %cst = arith.constant dense<0.000000e+00> : vector<8xf32>
    %5 = vector.multi_reduction <add>, %3, %cst [1] : vector<8x256xf32> to vector<8xf32>
    %6 = vector.shape_cast %5 : vector<8xf32> to vector<8x1xf32>
    %7 = arith.addf %4, %6 : vector<8x1xf32>
    %c0_4 = arith.constant 0 : index
    %c0_5 = arith.constant 0 : index
    %8 = vector.load %arg7[%c0_4, %c0_5] : memref<8x1xf32, #tpu.memory_space<vmem>>, vector<8x1xf32>
    tpu.vector_store %arg7[%c0_4, %c0_5], %7 {strides = array<i32>} : memref<8x1xf32, #tpu.memory_space<vmem>>, vector<8x1xf32>,
    %c0_i32_6 = arith.constant 0 : i32
    %9 = arith.cmpi eq, %arg1, %c0_i32_6 : i32
    %10 = arith.extui %9 : i1 to i32
    %c0_i32_7 = arith.constant 0 : i32
    %11 = arith.cmpi ne, %10, %c0_i32_7 : i32
    scf.if %11 {
      %c0_8 = arith.constant 0 : index
      %c0_9 = arith.constant 0 : index
      %12 = vector.load %arg7[%c0_8, %c0_9] : memref<8x1xf32, #tpu.memory_space<vmem>>, vector<8x1xf32>
      %c0_10 = arith.constant 0 : index
      %c0_11 = arith.constant 0 : index
      %13 = vector.load %arg3[%c0_10, %c0_11] : memref<8x10xf32, #tpu.memory_space<vmem>>, vector<8x10xf32>
      %14 = vector.broadcast %12 : vector<8x1xf32> to vector<8x10xf32>
      %15 = arith.mulf %14, %13 : vector<8x10xf32>
      %c0_12 = arith.constant 0 : index
      %c0_13 = arith.constant 0 : index
      %16 = vector.load %arg4[%c0_12, %c0_13] : memref<2x8xf32, #tpu.memory_space<vmem>>, vector<2x8xf32>
      %cst_14 = arith.constant dense<0.000000e+00> : vector<2x10xf32>
      %17 = tpu.matmul %16, %15, %cst_14 {dimension_numbers = #tpu.dot_dimension_numbers<[1], [0], [0], [1], [0, 0, 1, 1], [], []>} : vector<2x8xf32>, vector<8x10xf32>, vector<2x10xf32> -> vector<2x10xf32>
      %c0_15 = arith.constant 0 : index
      %c0_16 = arith.constant 0 : index
      %18 = vector.load %arg5[%c0_15, %c0_16] : memref<1x10xf32, #tpu.memory_space<vmem>>, vector<1x10xf32>
      %19 = vector.broadcast %18 : vector<1x10xf32> to vector<2x10xf32>
      %20 = arith.addf %17, %19 : vector<2x10xf32>
      %c0_17 = arith.constant 0 : index
      %c0_18 = arith.constant 0 : index
      %21 = vector.load %arg6[%c0_17, %c0_18] : memref<2x10xf32, #tpu.memory_space<vmem>>, vector<2x10xf32>
      tpu.vector_store %arg6[%c0_17, %c0_18], %20 {strides = array<i32>} : memref<2x10xf32, #tpu.memory_space<vmem>>, vector<2x10xf32>,
    } else {
    }
    return
  }
  func.func @transform_0(%arg0: i32, %arg1: i32) -> (i32, i32) {
    %c0_i32 = arith.constant 0 : i32
    return %arg0, %arg1 : i32, i32
  }
  func.func @transform_1(%arg0: i32, %arg1: i32) -> (i32, i32) {
    %c0_i32 = arith.constant 0 : i32
    %c0_i32_0 = arith.constant 0 : i32
    %c0_i32_1 = arith.constant 0 : i32
    return %c0_i32, %c0_i32_0 : i32, i32
  }
  func.func @transform_2(%arg0: i32, %arg1: i32) -> (i32, i32) {
    %c0_i32 = arith.constant 0 : i32
    %c0_i32_0 = arith.constant 0 : i32
    %c0_i32_1 = arith.constant 0 : i32
    return %c0_i32, %c0_i32_0 : i32, i32
  }
  func.func @transform_3(%arg0: i32, %arg1: i32) -> (i32, i32) {
    %c0_i32 = arith.constant 0 : i32
    %c0_i32_0 = arith.constant 0 : i32
    %c0_i32_1 = arith.constant 0 : i32
    return %c0_i32, %c0_i32_0 : i32, i32
  }
  func.func @transform_4(%arg0: i32, %arg1: i32) -> (i32, i32) {
    %c0_i32 = arith.constant 0 : i32
    %c0_i32_0 = arith.constant 0 : i32
    return %arg0, %c0_i32 : i32, i32
  }
}

</mosaic_0001>

<bundles_post_ra>
// kernel: tpu_custom_call.1
= control target key start
LH: loop header
LB: loop body
LE: loop exit
PB: predicated region body
PF: predicated region fallthrough
CT: control target
= control target key end

     0   :  { %9 = vsyncpa [#allocation4], 0  ;;  %s296_s0 = inlined_call_operand.hbm [shape: f32[8,256], index: 0, kind: input, shape index: {}]   ;;  %s297_s1 = inlined_call_operand.hbm [shape: f32[8,10], index: 1, kind: input, shape index: {}]   ;;  %s298_s2 = inlined_call_operand.vmem [shape: f32[2,8], index: 2, kind: input, shape index: {}]   ;;  %s299_s3 = inlined_call_operand.vmem [shape: f32[1,10], index: 3, kind: input, shape index: {}]   ;;  %s300_s4 = inlined_call_operand.hbm [shape: f32[2,10], index: 4, kind: output, shape index: {}]  }
   0x1   :  { %10 = vsyncpa [#allocation7], 0 }
   0x2   :  { %11 = vsyncpa [#allocation5], 0  ;;  %s250_s15 = smov [#allocation3]   ;;  %s251_s17 = smov [#allocation6]  }
   0x3   :  { %s18_s16 = sshll.u32 %s250_s15, 4  ;;  %s28_s18 = sshll.u32 %s251_s17, 4  ;;  %s19_s16 = int_to_ptr.vmem [resolvable:$true] %s18_s16  ;;  %s29_s18 = int_to_ptr.vmem [resolvable:$true] %s28_s18 }
   0x4   :  { %s192_s19 = scalar_lea.vmem %s19_s16, 256  ;;  %p197_p1 = scmp.lt.s32.totalorder %s19_s16, %s19_s16 }
   0x5   :  { %p193_p0 = scmp.ne.s32.totalorder %s19_s16, %s192_s19  ;;  %p198_p2 = scmp.lt.s32.totalorder %s192_s19, %s192_s19 }
   0x7   :  { %p199_p3 = por %p198_p2, %p197_p1 }
   0x9   :  { %p200_p4 = pnand %p199_p3, %p193_p0 }
   0xb   :  { %203 = shalt.err (!%p200_p4)
}
   0xc   :  { %21 = dma.hbm_to_vmem [thread:$0]  %s296_s0, 256, %s19_s16, [#allocation4]  }
   0xd   :  { %s212_s22 = scalar_lea.vmem %s29_s18, 128  ;;  %p217_p6 = scmp.lt.s32.totalorder %s29_s18, %s29_s18 }
   0xe   :  { %p213_p5 = scmp.ne.s32.totalorder %s29_s18, %s212_s22  ;;  %p218_p7 = scmp.lt.s32.totalorder %s212_s22, %s212_s22 }
  0x10   :  { %p219_p8 = por %p218_p7, %p217_p6 }
  0x12   :  { %p220_p9 = pnand %p219_p8, %p213_p5 }
  0x14   :  { %223 = shalt.err (!%p220_p9)
}
  0x15   :  { %31 = dma.hbm_to_vmem [thread:$0]  %s297_s1, 128, %s29_s18, [#allocation7]  }
  0x16   :  { %244 = dma.done.wait [#allocation4], 256  }
  0x17   :  { %245 = vsyncadd [#allocation4], 4294967040 }
  0x18   :  { %246 = dma.done.wait [#allocation7], 128  }
  0x19   :  { %247 = vsyncadd [#allocation7], 4294967168  ;;  %vm46_vm0 = vcmask 7168   ;;  %v252_v0 = vmov 0.0   ;;  %v48_v1 = vld [vmem:[#allocation3] sm:$0xff]  ;;  %v49_v2 = vld [vmem:[#allocation3 + $0x8] sm:$0xff] }
  0x1a   :  { %47 = vst.msk [vmem:[#allocation2] sm:$0xff] %vm46_vm0, %v252_v0  ;;  %172 = vmatprep.subr.mxu0 %v252_v0  ;;  %v51_v3 = vadd.f32 %v49_v2, %v48_v1  ;;  %v253_v4 = vmov 0   ;;  %vm254_vm1 = vmmov 0   ;;  %v61_v9 = vld [vmem:[#allocation6] sm:$0xff]  ;;  %v68_v12 = vld [vmem:[%s298_s2] sm:$0x3] }
  0x1b   :  { %183 = vset.pattern.permute.xlu0 %v253_v4  ;;  %174 = vmatprep.mubr.msk.f32.mxu0 %vm254_vm1, %v252_v0  ;;  %vm76_vm2 = vcmask 64512   ;;  %v168_v13 = vld [vmem:[%s299_s3] ss:$0 sm:$0xff]  ;;  %s255_s27 = smov [#allocation8]   ;;  %vm150_vm3 = vcmask 74752  }
  0x1c   :  { %52 = vadd.xlane.f32.xlu0 %v51_v3  ;;  %s158_s28 = sshll.u32 %s255_s27, 4  ;;  %s159_s28 = int_to_ptr.vmem [resolvable:$true] %s158_s28 }
  0x1d   :  { %s224_s29 = scalar_lea.vmem %s159_s28, 32  ;;  %p229_p11 = scmp.lt.s32.totalorder %s159_s28, %s159_s28 }
  0x1e   :  { %p225_p10 = scmp.ne.s32.totalorder %s159_s28, %s224_s29  ;;  %p230_p12 = scmp.lt.s32.totalorder %s224_s29, %s224_s29 }
  0x20   :  { %p231_p13 = por %p230_p12, %p229_p11 }
  0x21   :  { %v50_v5 = vld [vmem:[#allocation2] sm:$0xff] }
  0x22   :  { %p232_p0 = pnand %p231_p13, %p225_p10 }
  0xa5   :  { %v53_v6 = vpop.xlane.xlu0 %52 }
  0xa6   :  { %v54_v7 = vadd.f32 %v53_v6, %v50_v5 }
  0xa8   :  { %56 = vst.msk [vmem:[#allocation2] sm:$0xff] %vm46_vm0, %v54_v7 }
  0xaf   :  { %v60_v8 = vld [vmem:[#allocation2] sm:$0xff] }
  0xb0   :  { %64 = vperm.xlu0 %183, %v60_v8  }
 0x12b   :  { %v65_v10 = vpop.permute.xlu0 %64 }
 0x12c   :  { %v67_v11 = vmul.f32 %v65_v10, %v61_v9 }
 0x12e   :  { %173 = vmatpush3.msra.mxu0 %v67_v11 }
 0x12f   :  { %175 = vmatmul.mubr.msk.f32.vlgmr.msra.gmra.mxu0 %vm76_vm2, %v68_v12 }
 0x1ef   :  { %v146_v14 = vpop.f32.mrf.mxu0 }
 0x1f0   :  { %v147_v15 = vadd.f32 %v168_v13, %v146_v14 }
 0x1f1   :  { %v176_v16 = vpop.f32.mrf.mxu0 }
 0x1f2   :  { %151 = vst.msk [vmem:[#allocation8] sm:$0x3] %vm150_vm3, %v147_v15 }
 0x1f3   :  { %235 = shalt.err (!%p232_p0)
}
 0x1f4   :  { %161 = dma.vmem_to_hbm [thread:$0]  %s159_s28, 32, %s300_s4, [#allocation5]  }
 0x1f5   :  { %248 = dma.done.wait [#allocation5], 32  }
 0x1f6   :  { %249 = vsyncadd [#allocation5], 4294967264 }
 0x1f7   :  { %165 = vsyncpa [#allocation4], 1 }
 0x1f8   :  { %166 = vsyncpa [#allocation7], 1 }
 0x1f9   :  { %167 = vsyncpa [#allocation5], 1 }

</bundles_post_ra>
